<compile_context>
chip_gen: v5e
topology: v5e:2x2
jax: 0.10.0
libtpu: 0.0.40
codegen_flags: <defaults>
</compile_context>

<pallas_src>
import functools

import jax
import jax.numpy as jnp
from jax.experimental import pallas as pl
from jax.experimental.pallas import tpu as pltpu


def _round_up(n, m):
    return ((n + m - 1) // m) * m


def _dnn_kernel(n_layers, has_dropout, *refs):
    """Fused MLP tile kernel: (Linear -> ReLU) x n_layers, then Dropout.

    refs = (x_ref, w_0..w_{n-1}, b_0..b_{n-1}, [mask_ref], o_ref)
    """
    x_ref = refs[0]
    w_refs = refs[1:1 + n_layers]
    b_refs = refs[1 + n_layers:1 + 2 * n_layers]
    rest = refs[1 + 2 * n_layers:]
    if has_dropout:
        mask_ref, o_ref = rest
    else:
        (o_ref,) = rest

    h = x_ref[...].astype(jnp.float32)
    for w_ref, b_ref in zip(w_refs, b_refs):
        # Single-pass bf16 MXU matmul with f32 accumulation.
        h = jnp.dot(h.astype(jnp.bfloat16), w_ref[...],
                    preferred_element_type=jnp.float32)
        h = jnp.maximum(h + b_ref[...], 0.0)   # bias + ReLU on the VPU (f32)

    if has_dropout:
        # Pre-scaled inverted-dropout multiplier (keep/(1-p) or 0), f32.
        h = h * mask_ref[...]

    o_ref[...] = h.astype(o_ref.dtype)


def dnn_forward(x, weights, biases, *, dropout_p, dropout_key=None,
                training=True, block_m=512):
    """x: (B, hidden_units[0]) f32. weights[i]: (in_i, out_i) (pre-transposed
    vs. torch's (out, in)). biases[i]: (out_i,)."""
    n_layers = len(weights)
    B, in_dim = x.shape
    out_dim = weights[-1].shape[1]

    # --- batch tiling ------------------------------------------------------
    tm = min(block_m, _round_up(B, 8))       # sublane-aligned batch tile
    b_pad = _round_up(B, tm)
    if b_pad != B:
        x = jnp.pad(x, ((0, b_pad - B), (0, 0)))
    n_tiles = b_pad // tm

    # --- parameter prep ----------------------------------------------------
    w_bf16 = [w.astype(jnp.bfloat16) for w in weights]         # MXU operands
    biases2d = [b.reshape(1, -1).astype(jnp.float32) for b in biases]

    has_dropout = bool(training) and float(dropout_p) > 0.0
    extra_args, extra_specs = [], []
    if has_dropout:
        if dropout_key is None:
            dropout_key = jax.random.PRNGKey(0)
        keep = jax.random.bernoulli(dropout_key, 1.0 - float(dropout_p),
                                    (b_pad, out_dim))
        mask = keep.astype(jnp.float32) * (1.0 / (1.0 - float(dropout_p)))
        extra_args.append(mask)
        extra_specs.append(pl.BlockSpec((tm, out_dim), lambda i: (i, 0)))

    resident = lambda arr: pl.BlockSpec(arr.shape, lambda i: (0, 0))

    in_specs = ([pl.BlockSpec((tm, in_dim), lambda i: (i, 0))]
                + [resident(w) for w in w_bf16]
                + [resident(b) for b in biases2d]
                + extra_specs)
    # NOTE: out_dim (16) < 128 lanes -> masked vst; acceptable (tiny output).
    out_specs = pl.BlockSpec((tm, out_dim), lambda i: (i, 0))

    kernel = functools.partial(_dnn_kernel, n_layers, has_dropout)

    out = pl.pallas_call(
        kernel,
        out_shape=jax.ShapeDtypeStruct((b_pad, out_dim), jnp.float32),
        grid=(n_tiles,),
        in_specs=in_specs,
        out_specs=out_specs,
        compiler_params=pltpu.CompilerParams(
            dimension_semantics=("parallel",),   # shard batch tiles across TCs (v7x)
        ),
    )(x, *w_bf16, *biases2d, *extra_args)

    return out[:B] if b_pad != B else out


def init_dnn_params(key, hidden_units):
    """Deterministic init matching torch nn.Linear's U(-1/sqrt(in), 1/sqrt(in))."""
    weights, biases = [], []
    for fan_in, fan_out in zip(hidden_units[:-1], hidden_units[1:]):
        key, kw, kb = jax.random.split(key, 3)
        bound = 1.0 / jnp.sqrt(fan_in)
        # Stored already transposed: (in, out).
        weights.append(jax.random.uniform(kw, (fan_in, fan_out), jnp.float32,
                                          minval=-bound, maxval=bound))
        biases.append(jax.random.uniform(kb, (fan_out,), jnp.float32,
                                         minval=-bound, maxval=bound))
    return weights, biases


if __name__ == "__main__":
    hidden_units = [32, 64, 32, 16]   # DNN(hidden_units=[32, 64, 32, 16], dropout=0.2)
    dropout_p = 0.2
    batch = 8

    key = jax.random.PRNGKey(0)
    key, kx, kdrop = jax.random.split(key, 3)
    x = jax.random.normal(kx, (batch, hidden_units[0]), dtype=jnp.float32)

    weights, biases = init_dnn_params(key, hidden_units)

    out = dnn_forward(x, weights, biases, dropout_p=dropout_p,
                      dropout_key=kdrop, training=True)
    out = jax.block_until_ready(out)

    assert out.shape == (batch, hidden_units[-1])
    assert out.dtype == jnp.float32
    print("KERNEL_OK")
</pallas_src>

<mosaic_0001>
module attributes {stable_mosaic.version = 11 : i64} {
  func.func @_dnn_kernel(%arg0: i32, %arg1: memref<8x32xf32, #tpu.memory_space<vmem>>, %arg2: memref<32x64xbf16, #tpu.memory_space<vmem>>, %arg3: memref<64x32xbf16, #tpu.memory_space<vmem>>, %arg4: memref<32x16xbf16, #tpu.memory_space<vmem>>, %arg5: memref<1x64xf32, #tpu.memory_space<vmem>>, %arg6: memref<1x32xf32, #tpu.memory_space<vmem>>, %arg7: memref<1x16xf32, #tpu.memory_space<vmem>>, %arg8: memref<8x16xf32, #tpu.memory_space<vmem>>, %arg9: memref<8x16xf32, #tpu.memory_space<vmem>>) attributes {dimension_semantics = [#tpu.dimension_semantics<parallel>], iteration_bounds = array<i64: 1>, scalar_prefetch = 0 : i64, scratch_operands = 0 : i64, tpu.core_type = #tpu.core_type<tc>, window_params = [{transform_indices = @transform_0, window_bounds = array<i64: 8, 32>}, {pipeline_mode = #tpu.pipeline_mode<synchronous>, transform_indices = @transform_1, window_bounds = array<i64: 32, 64>}, {pipeline_mode = #tpu.pipeline_mode<synchronous>, transform_indices = @transform_2, window_bounds = array<i64: 64, 32>}, {pipeline_mode = #tpu.pipeline_mode<synchronous>, transform_indices = @transform_3, window_bounds = array<i64: 32, 16>}, {pipeline_mode = #tpu.pipeline_mode<synchronous>, transform_indices = @transform_4, window_bounds = array<i64: 1, 64>}, {pipeline_mode = #tpu.pipeline_mode<synchronous>, transform_indices = @transform_5, window_bounds = array<i64: 1, 32>}, {pipeline_mode = #tpu.pipeline_mode<synchronous>, transform_indices = @transform_6, window_bounds = array<i64: 1, 16>}, {transform_indices = @transform_7, window_bounds = array<i64: 8, 16>}, {transform_indices = @transform_8, window_bounds = array<i64: 8, 16>}]} {
    %c0 = arith.constant 0 : index
    %c0_0 = arith.constant 0 : index
    %0 = vector.load %arg1[%c0, %c0_0] : memref<8x32xf32, #tpu.memory_space<vmem>>, vector<8x32xf32>
    %1 = arith.truncf %0 : vector<8x32xf32> to vector<8x32xbf16>
    %c0_1 = arith.constant 0 : index
    %c0_2 = arith.constant 0 : index
    %2 = vector.load %arg2[%c0_1, %c0_2] : memref<32x64xbf16, #tpu.memory_space<vmem>>, vector<32x64xbf16>
    %cst = arith.constant dense<0.000000e+00> : vector<8x64xf32>
    %3 = tpu.matmul %1, %2, %cst {dimension_numbers = #tpu.dot_dimension_numbers<[1], [0], [0], [1], [0, 0, 1, 1], [], []>} : vector<8x32xbf16>, vector<32x64xbf16>, vector<8x64xf32> -> vector<8x64xf32>
    %c0_3 = arith.constant 0 : index
    %c0_4 = arith.constant 0 : index
    %4 = vector.load %arg5[%c0_3, %c0_4] : memref<1x64xf32, #tpu.memory_space<vmem>>, vector<1x64xf32>
    %5 = vector.broadcast %4 : vector<1x64xf32> to vector<8x64xf32>
    %6 = arith.addf %3, %5 : vector<8x64xf32>
    %cst_5 = arith.constant 0.000000e+00 : f32
    %7 = vector.broadcast %cst_5 : f32 to vector<8x64xf32>
    %8 = arith.maximumf %6, %7 : vector<8x64xf32>
    %9 = arith.truncf %8 : vector<8x64xf32> to vector<8x64xbf16>
    %c0_6 = arith.constant 0 : index
    %c0_7 = arith.constant 0 : index
    %10 = vector.load %arg3[%c0_6, %c0_7] : memref<64x32xbf16, #tpu.memory_space<vmem>>, vector<64x32xbf16>
    %cst_8 = arith.constant dense<0.000000e+00> : vector<8x32xf32>
    %11 = tpu.matmul %9, %10, %cst_8 {dimension_numbers = #tpu.dot_dimension_numbers<[1], [0], [0], [1], [0, 0, 1, 1], [], []>} : vector<8x64xbf16>, vector<64x32xbf16>, vector<8x32xf32> -> vector<8x32xf32>
    %c0_9 = arith.constant 0 : index
    %c0_10 = arith.constant 0 : index
    %12 = vector.load %arg6[%c0_9, %c0_10] : memref<1x32xf32, #tpu.memory_space<vmem>>, vector<1x32xf32>
    %13 = vector.broadcast %12 : vector<1x32xf32> to vector<8x32xf32>
    %14 = arith.addf %11, %13 : vector<8x32xf32>
    %cst_11 = arith.constant 0.000000e+00 : f32
    %15 = vector.broadcast %cst_11 : f32 to vector<8x32xf32>
    %16 = arith.maximumf %14, %15 : vector<8x32xf32>
    %17 = arith.truncf %16 : vector<8x32xf32> to vector<8x32xbf16>
    %c0_12 = arith.constant 0 : index
    %c0_13 = arith.constant 0 : index
    %18 = vector.load %arg4[%c0_12, %c0_13] : memref<32x16xbf16, #tpu.memory_space<vmem>>, vector<32x16xbf16>
    %cst_14 = arith.constant dense<0.000000e+00> : vector<8x16xf32>
    %19 = tpu.matmul %17, %18, %cst_14 {dimension_numbers = #tpu.dot_dimension_numbers<[1], [0], [0], [1], [0, 0, 1, 1], [], []>} : vector<8x32xbf16>, vector<32x16xbf16>, vector<8x16xf32> -> vector<8x16xf32>
    %c0_15 = arith.constant 0 : index
    %c0_16 = arith.constant 0 : index
    %20 = vector.load %arg7[%c0_15, %c0_16] : memref<1x16xf32, #tpu.memory_space<vmem>>, vector<1x16xf32>
    %21 = vector.broadcast %20 : vector<1x16xf32> to vector<8x16xf32>
    %22 = arith.addf %19, %21 : vector<8x16xf32>
    %cst_17 = arith.constant 0.000000e+00 : f32
    %23 = vector.broadcast %cst_17 : f32 to vector<8x16xf32>
    %24 = arith.maximumf %22, %23 : vector<8x16xf32>
    %c0_18 = arith.constant 0 : index
    %c0_19 = arith.constant 0 : index
    %25 = vector.load %arg8[%c0_18, %c0_19] : memref<8x16xf32, #tpu.memory_space<vmem>>, vector<8x16xf32>
    %26 = arith.mulf %24, %25 : vector<8x16xf32>
    %c0_20 = arith.constant 0 : index
    %c0_21 = arith.constant 0 : index
    %27 = vector.load %arg9[%c0_20, %c0_21] : memref<8x16xf32, #tpu.memory_space<vmem>>, vector<8x16xf32>
    tpu.vector_store %arg9[%c0_20, %c0_21], %26 {strides = array<i32>} : memref<8x16xf32, #tpu.memory_space<vmem>>, vector<8x16xf32>,
    return
  }
  func.func @transform_0(%arg0: i32) -> (i32, i32) {
    %c0_i32 = arith.constant 0 : i32
    %c0_i32_0 = arith.constant 0 : i32
    return %arg0, %c0_i32 : i32, i32
  }
  func.func @transform_1(%arg0: i32) -> (i32, i32) {
    %c0_i32 = arith.constant 0 : i32
    %c0_i32_0 = arith.constant 0 : i32
    %c0_i32_1 = arith.constant 0 : i32
    return %c0_i32, %c0_i32_0 : i32, i32
  }
  func.func @transform_2(%arg0: i32) -> (i32, i32) {
    %c0_i32 = arith.constant 0 : i32
    %c0_i32_0 = arith.constant 0 : i32
    %c0_i32_1 = arith.constant 0 : i32
    return %c0_i32, %c0_i32_0 : i32, i32
  }
  func.func @transform_3(%arg0: i32) -> (i32, i32) {
    %c0_i32 = arith.constant 0 : i32
    %c0_i32_0 = arith.constant 0 : i32
    %c0_i32_1 = arith.constant 0 : i32
    return %c0_i32, %c0_i32_0 : i32, i32
  }
  func.func @transform_4(%arg0: i32) -> (i32, i32) {
    %c0_i32 = arith.constant 0 : i32
    %c0_i32_0 = arith.constant 0 : i32
    %c0_i32_1 = arith.constant 0 : i32
    return %c0_i32, %c0_i32_0 : i32, i32
  }
  func.func @transform_5(%arg0: i32) -> (i32, i32) {
    %c0_i32 = arith.constant 0 : i32
    %c0_i32_0 = arith.constant 0 : i32
    %c0_i32_1 = arith.constant 0 : i32
    return %c0_i32, %c0_i32_0 : i32, i32
  }
  func.func @transform_6(%arg0: i32) -> (i32, i32) {
    %c0_i32 = arith.constant 0 : i32
    %c0_i32_0 = arith.constant 0 : i32
    %c0_i32_1 = arith.constant 0 : i32
    return %c0_i32, %c0_i32_0 : i32, i32
  }
  func.func @transform_7(%arg0: i32) -> (i32, i32) {
    %c0_i32 = arith.constant 0 : i32
    %c0_i32_0 = arith.constant 0 : i32
    return %arg0, %c0_i32 : i32, i32
  }
  func.func @transform_8(%arg0: i32) -> (i32, i32) {
    %c0_i32 = arith.constant 0 : i32
    %c0_i32_0 = arith.constant 0 : i32
    return %arg0, %c0_i32 : i32, i32
  }
}

</mosaic_0001>

<bundles_post_ra>
// kernel: tpu_custom_call.1
= control target key start
LH: loop header
LB: loop body
LE: loop exit
PB: predicated region body
PF: predicated region fallthrough
CT: control target
= control target key end

     0   :  { %s347_s0 = inlined_call_operand.vmem [shape: f32[8,32], index: 0, kind: input, shape index: {}]   ;;  %s348_s1 = inlined_call_operand.vmem [shape: bf16[32,64], index: 1, kind: input, shape index: {}]   ;;  %s349_s2 = inlined_call_operand.vmem [shape: bf16[64,32], index: 2, kind: input, shape index: {}]   ;;  %s350_s3 = inlined_call_operand.vmem [shape: bf16[32,16], index: 3, kind: input, shape index: {}]   ;;  %s351_s4 = inlined_call_operand.vmem [shape: f32[1,64], index: 4, kind: input, shape index: {}]   ;;  %s352_s5 = inlined_call_operand.vmem [shape: f32[1,32], index: 5, kind: input, shape index: {}]   ;;  %s353_s6 = inlined_call_operand.vmem [shape: f32[1,16], index: 6, kind: input, shape index: {}]   ;;  %s354_s7 = inlined_call_operand.vmem [shape: f32[8,16], index: 7, kind: input, shape index: {}]   ;;  %s355_s8 = inlined_call_operand.hbm [shape: f32[8,16], index: 8, kind: output, shape index: {}]  }
   0x1   :  { %v220_v0 = vld [vmem:[%s348_s1 + $0x8] sm:$0xff]  ;;  %v219_v1 = vld [vmem:[%s348_s1] sm:$0xff]  ;;  %v224_v2 = vld [vmem:[%s349_s2 + $0x18] sm:$0xff] }
   0x2   :  { %63 = vmatpush.bf16.msra.mxu0 %v220_v0  ;;  %v31_v3 = vld [vmem:[%s347_s0] sm:$0xff]  ;;  %116 = vmatpush.bf16.msra.mxu1 %v224_v2  ;;  %v223_v4 = vld [vmem:[%s349_s2 + $0x10] sm:$0xff] }
   0x3   :  { %13 = vsyncpa [#allocation3], 0  ;;  %v32_v5 = vpack.c.bf16 %v31_v3, %v31_v3  ;;  %vm53_vm0 = vcmask 261120   ;;  %v222_v6 = vld [vmem:[%s349_s2 + $0x8] sm:$0xff]  ;;  %v221_v7 = vld [vmem:[%s349_s2] sm:$0xff]  ;;  %vm108_vm1 = vcmask 523264  }
   0x4   :  { %v228_v8 = vld [vmem:[%s351_s4] ss:$0 sm:$0xff]  ;;  %v226_v14 = vld [vmem:[%s350_s3 + $0x8] sm:$0xff]  ;;  %s257_s26 = smov [#allocation2]   ;;  %s175_s29 = sshll.u32 %s355_s8, 4  ;;  %vm166_vm2 = vcmask 130048   ;;  %s176_s29 = int_to_ptr.hbm [resolvable:$true] %s175_s29 }
   0x5   :  { %156 = vmatpush.bf16.msra.mxu2 %v226_v14  ;;  %v225_v15 = vld [vmem:[%s350_s3] sm:$0xff]  ;;  %s173_s27 = sshll.u32 %s257_s26, 4  ;;  %s174_s27 = int_to_ptr.vmem [resolvable:$true] %s173_s27 }
   0x6   :  { %64 = vmatpush.bf16.msra.mxu0 %v219_v1  ;;  %117 = vmatpush.bf16.msra.mxu1 %v223_v4  ;;  %v229_v16 = vld [vmem:[%s352_s5] ss:$0 sm:$0xff] }
   0x7   :  { %v230_v22 = vld [vmem:[%s353_s6] ss:$0 sm:$0xff] }
   0x8   :  { %v164_v25 = vld [vmem:[%s354_s7] sm:$0xff] }
   0x9   :  { %192 = vmatmul.msk.bf16.vlgmr.msra.gmra.mxu0 %vm53_vm0, %v32_v5  ;;  %157 = vmatpush.bf16.msra.mxu2 %v225_v15 }
   0xa   :  { %118 = vmatpush.bf16.msra.mxu1 %v222_v6 }
   0xe   :  { %119 = vmatpush.bf16.msra.mxu1 %v221_v7 }
  0x86   :  { %v66_v9 = vpop.f32.mrf.mxu0 }
  0x87   :  { %v67_v10 = vadd.f32 %v228_v8, %v66_v9 }
  0x89   :  { %v70_v11 = vmax.f32 %v67_v10, 0.0 }
  0x8b   :  { %v71_v12 = vpack.c.bf16 %v70_v11, %v70_v11 }
  0x8d   :  { %209 = vmatmul.msk.bf16.vlgmr.msra.gmra.mxu1 %vm108_vm1, %v71_v12 }
  0x8e   :  { %v68_v13 = vpop.f32.mrf.mxu0 }
 0x10a   :  { %v121_v17 = vpop.f32.mrf.mxu1 }
 0x10b   :  { %v122_v18 = vadd.f32 %v229_v16, %v121_v17 }
 0x10d   :  { %v125_v19 = vmax.f32 %v122_v18, 0.0 }
 0x10f   :  { %v126_v20 = vpack.c.bf16 %v125_v19, %v125_v19 }
 0x111   :  { %218 = vmatmul.msk.bf16.vlgmr.msra.gmra.mxu2 %vm53_vm0, %v126_v20 }
 0x112   :  { %v123_v21 = vpop.f32.mrf.mxu1 }
 0x194   :  { %v159_v23 = vpop.f32.mrf.mxu2 }
 0x195   :  { %v160_v24 = vadd.f32 %v230_v22, %v159_v23 }
 0x197   :  { %v163_v26 = vmax.f32 %v160_v24, 0.0 }
 0x199   :  { %v165_v27 = vmul.f32 %v164_v25, %v163_v26 }
 0x19b   :  { %167 = vst.msk [vmem:[#allocation2] sm:$0xff] %vm166_vm2, %v165_v27 }
 0x19c   :  { %v161_v28 = vpop.f32.mrf.mxu2  ;;  %178 = dma.vmem_to_hbm [thread:$0]  %s174_s27, 128, %s176_s29, [#allocation3]  }
 0x19d   :  { %255 = dma.done.wait [#allocation3], 128  }
 0x19e   :  { %256 = vsyncadd [#allocation3], 4294967168 }
 0x19f   :  { %183 = vsyncpa [#allocation3], 1 }

</bundles_post_ra>
